<compile_context>
chip_gen: v6e
topology: v6e:2x2x1
jax: 0.10.0
libtpu: 0.0.40
codegen_flags: <defaults>
</compile_context>

<pallas_src>
import jax
import jax.numpy as jnp
from jax.experimental import pallas as pl
from jax.experimental.pallas import tpu as pltpu


LN_EPS = 1e-5  # PyTorch nn.LayerNorm default


def final_kernel(x_ref, w1_ref, b1_ref, g_ref, beta_ref,
                 w2_ref, b2_ref, w3_ref, b3_ref, o_ref):
    # x block: (TB, S, E) f32.  Sequence reduction is a plain sum; the 1/S of
    # the mean is pre-folded into w1 (saves a VPU multiply per step).
    pooled = jnp.sum(x_ref[...].astype(jnp.float32), axis=1)             # (TB, E)

    # ---- Linear(E -> I): bf16 operands on the MXU, f32 accumulation ----
    h1 = jnp.dot(pooled.astype(jnp.bfloat16), w1_ref[...],
                 preferred_element_type=jnp.float32) + b1_ref[...]       # (TB, I) f32

    # ---- LayerNorm over last dim (f32 VPU math; no bf16 elementwise) ----
    mu = jnp.mean(h1, axis=-1, keepdims=True)
    var = jnp.mean((h1 - mu) * (h1 - mu), axis=-1, keepdims=True)
    h1n = (h1 - mu) * jax.lax.rsqrt(var + LN_EPS) * g_ref[...] + beta_ref[...]

    # ---- ReLU (+ identity dropout, p=1e-7) ----
    h1r = jnp.maximum(h1n, 0.0)

    # ---- Linear(I -> I) ----
    h2 = jnp.dot(h1r.astype(jnp.bfloat16), w2_ref[...],
                 preferred_element_type=jnp.float32) + b2_ref[...]       # (TB, I) f32
    h2r = jnp.maximum(h2, 0.0)

    # ---- Linear(I -> O_pad): output lane-padded to 128 -> unmasked stores ----
    out = jnp.dot(h2r.astype(jnp.bfloat16), w3_ref[...],
                  preferred_element_type=jnp.float32) + b3_ref[...]      # (TB, O_pad)
    o_ref[...] = out.astype(o_ref.dtype)


def _round_up(x, m):
    return (x + m - 1) // m * m


def _choose_tb(b_pad, s, e, i, o_pad, vmem_budget_bytes=32 * 1024 * 1024):
    """Largest multiple-of-8 batch tile fitting a VMEM budget sized for v7x.

    Budget accounts for: double-buffered x block (f32), double-buffered output
    block (f32), per-row activations (f32), and resident bf16 weights / f32
    biases.  32 MiB budget leaves headroom inside v7x's 64 MiB VMEM.
    """
    resident = 2 * (e * i + i * i + i * o_pad) + 4 * (4 * i + o_pad)
    per_row = 2 * s * e * 4 + 2 * o_pad * 4 + (e + 2 * i + o_pad) * 4
    avail = max(vmem_budget_bytes - resident, 8 * per_row)
    tb = (avail // per_row) // 8 * 8
    return max(8, min(b_pad, 512, tb))


def final_forward(x, params, max_batch_tile=512):
    """x: (B, S, E) float32. params: weights (in, out) and biases (1, dim)."""
    B, S, E = x.shape
    I = params["w1"].shape[1]
    O = params["w3"].shape[1]
    O_pad = _round_up(O, 128)                      # lane-dense output width

    # --- parameter prep (traced alongside the kernel) ---
    # fold 1/S of the sequence mean into w1; bf16 matmul weights; pad w3/b3 lanes
    w1 = (params["w1"] / S).astype(jnp.bfloat16)
    w2 = params["w2"].astype(jnp.bfloat16)
    w3 = jnp.zeros((I, O_pad), jnp.bfloat16).at[:, :O].set(
        params["w3"].astype(jnp.bfloat16))
    b3 = jnp.zeros((1, O_pad), jnp.float32).at[:, :O].set(params["b3"])

    # --- batch tiling ---
    b_pad8 = _round_up(B, 8)
    TB = _choose_tb(b_pad8, S, E, I, O_pad)
    TB = max(8, min(TB, _round_up(max_batch_tile, 8), b_pad8)) // 8 * 8
    B_pad = _round_up(B, TB)
    if B_pad != B:
        x = jnp.pad(x, ((0, B_pad - B), (0, 0), (0, 0)))

    grid = (B_pad // TB,)
    const = lambda i: (0, 0)                       # weights stay VMEM-resident

    out = pl.pallas_call(
        final_kernel,
        out_shape=jax.ShapeDtypeStruct((B_pad, O_pad), jnp.float32),
        grid=grid,
        in_specs=[
            pl.BlockSpec((TB, S, E), lambda i: (i, 0, 0)),   # x: batch-tiled
            pl.BlockSpec((E, I), const),                     # w1 (bf16, pre-scaled 1/S)
            pl.BlockSpec((1, I), const),                     # b1
            pl.BlockSpec((1, I), const),                     # ln gamma
            pl.BlockSpec((1, I), const),                     # ln beta
            pl.BlockSpec((I, I), const),                     # w2 (bf16)
            pl.BlockSpec((1, I), const),                     # b2
            pl.BlockSpec((I, O_pad), const),                 # w3 (bf16, lane-padded)
            pl.BlockSpec((1, O_pad), const),                 # b3 (lane-padded)
        ],
        out_specs=pl.BlockSpec((TB, O_pad), lambda i: (i, 0)),
        compiler_params=pltpu.CompilerParams(
            dimension_semantics=("parallel",),               # 2x on v7x dual-TC
            vmem_limit_bytes=48 * 1024 * 1024,
        ),
    )(x, w1, params["b1"], params["ln_g"], params["ln_b"],
      w2, params["b2"], w3, b3)

    return out[:B, :O]


def init_params(key, embedding_size, internal_size, output_size):
    """Deterministic init mimicking PyTorch defaults (uniform +-1/sqrt(fan_in))."""
    ks = jax.random.split(key, 6)

    def lin(kw, kb, fan_in, fan_out):
        bound = 1.0 / jnp.sqrt(fan_in)
        w = jax.random.uniform(kw, (fan_in, fan_out), jnp.float32, -bound, bound)
        b = jax.random.uniform(kb, (1, fan_out), jnp.float32, -bound, bound)
        return w, b

    w1, b1 = lin(ks[0], ks[1], embedding_size, internal_size)
    w2, b2 = lin(ks[2], ks[3], internal_size, internal_size)
    w3, b3 = lin(ks[4], ks[5], internal_size, output_size)
    ln_g = jnp.ones((1, internal_size), jnp.float32)
    ln_b = jnp.zeros((1, internal_size), jnp.float32)
    return {"w1": w1, "b1": b1, "ln_g": ln_g, "ln_b": ln_b,
            "w2": w2, "b2": b2, "w3": w3, "b3": b3}


def final_ref(x, p):
    """Pure-JAX f32 reference for correctness check."""
    pooled = jnp.mean(x, axis=1)
    h1 = pooled @ p["w1"] + p["b1"]
    mu = jnp.mean(h1, axis=-1, keepdims=True)
    var = jnp.mean((h1 - mu) ** 2, axis=-1, keepdims=True)
    h1 = (h1 - mu) / jnp.sqrt(var + LN_EPS) * p["ln_g"] + p["ln_b"]
    h1 = jnp.maximum(h1, 0.0)
    h2 = jnp.maximum(h1 @ p["w2"] + p["b2"], 0.0)
    return h2 @ p["w3"] + p["b3"]


if __name__ == "__main__":
    # Small shapes consistent with the module's forward: ds is (batch, seq, embedding).
    # B=20 with max_batch_tile=8 exercises a multi-step grid plus batch padding.
    B, S, E = 20, 8, 32
    INTERNAL, OUT = 32, 2

    key = jax.random.PRNGKey(0)
    kx, kp = jax.random.split(key)
    x = jax.random.normal(kx, (B, S, E), jnp.float32)
    params = init_params(kp, E, INTERNAL, OUT)

    fwd = jax.jit(lambda xx, pp: final_forward(xx, pp, max_batch_tile=8))
    out = jax.block_until_ready(fwd(x, params))

    ref = final_ref(x, params)
    assert out.shape == (B, OUT)
    # bf16 matmul operands (f32 accumulation) -> loosened tolerance vs f32 reference.
    assert jnp.allclose(out, ref, atol=2e-2, rtol=2e-2), "mismatch vs reference"

    print("KERNEL_OK")
</pallas_src>

<mosaic_0001>
module attributes {stable_mosaic.version = 11 : i64} {
  func.func @final_kernel(%arg0: i32, %arg1: memref<8x8x32xf32, #tpu.memory_space<vmem>>, %arg2: memref<32x32xbf16, #tpu.memory_space<vmem>>, %arg3: memref<1x32xf32, #tpu.memory_space<vmem>>, %arg4: memref<1x32xf32, #tpu.memory_space<vmem>>, %arg5: memref<1x32xf32, #tpu.memory_space<vmem>>, %arg6: memref<32x32xbf16, #tpu.memory_space<vmem>>, %arg7: memref<1x32xf32, #tpu.memory_space<vmem>>, %arg8: memref<32x128xbf16, #tpu.memory_space<vmem>>, %arg9: memref<1x128xf32, #tpu.memory_space<vmem>>, %arg10: memref<8x128xf32, #tpu.memory_space<vmem>>) attributes {dimension_semantics = [#tpu.dimension_semantics<parallel>], iteration_bounds = array<i64: 3>, scalar_prefetch = 0 : i64, scratch_operands = 0 : i64, tpu.core_type = #tpu.core_type<tc>, window_params = [{transform_indices = @transform_0, window_bounds = array<i64: 8, 8, 32>}, {pipeline_mode = #tpu.pipeline_mode<synchronous>, transform_indices = @transform_1, window_bounds = array<i64: 32, 32>}, {pipeline_mode = #tpu.pipeline_mode<synchronous>, transform_indices = @transform_2, window_bounds = array<i64: 1, 32>}, {pipeline_mode = #tpu.pipeline_mode<synchronous>, transform_indices = @transform_3, window_bounds = array<i64: 1, 32>}, {pipeline_mode = #tpu.pipeline_mode<synchronous>, transform_indices = @transform_4, window_bounds = array<i64: 1, 32>}, {pipeline_mode = #tpu.pipeline_mode<synchronous>, transform_indices = @transform_5, window_bounds = array<i64: 32, 32>}, {pipeline_mode = #tpu.pipeline_mode<synchronous>, transform_indices = @transform_6, window_bounds = array<i64: 1, 32>}, {pipeline_mode = #tpu.pipeline_mode<synchronous>, transform_indices = @transform_7, window_bounds = array<i64: 32, 128>}, {pipeline_mode = #tpu.pipeline_mode<synchronous>, transform_indices = @transform_8, window_bounds = array<i64: 1, 128>}, {transform_indices = @transform_9, window_bounds = array<i64: 8, 128>}]} {
    %c0 = arith.constant 0 : index
    %c0_0 = arith.constant 0 : index
    %c0_1 = arith.constant 0 : index
    %0 = vector.load %arg1[%c0, %c0_0, %c0_1] : memref<8x8x32xf32, #tpu.memory_space<vmem>>, vector<8x8x32xf32>
    %cst = arith.constant dense<0.000000e+00> : vector<8x32xf32>
    %1 = vector.multi_reduction <add>, %0, %cst [1] : vector<8x8x32xf32> to vector<8x32xf32>
    %2 = arith.truncf %1 : vector<8x32xf32> to vector<8x32xbf16>
    %c0_2 = arith.constant 0 : index
    %c0_3 = arith.constant 0 : index
    %3 = vector.load %arg2[%c0_2, %c0_3] : memref<32x32xbf16, #tpu.memory_space<vmem>>, vector<32x32xbf16>
    %cst_4 = arith.constant dense<0.000000e+00> : vector<8x32xf32>
    %4 = tpu.matmul %2, %3, %cst_4 {dimension_numbers = #tpu.dot_dimension_numbers<[1], [0], [0], [1], [0, 0, 1, 1], [], []>} : vector<8x32xbf16>, vector<32x32xbf16>, vector<8x32xf32> -> vector<8x32xf32>
    %c0_5 = arith.constant 0 : index
    %c0_6 = arith.constant 0 : index
    %5 = vector.load %arg3[%c0_5, %c0_6] : memref<1x32xf32, #tpu.memory_space<vmem>>, vector<1x32xf32>
    %6 = vector.broadcast %5 : vector<1x32xf32> to vector<8x32xf32>
    %7 = arith.addf %4, %6 : vector<8x32xf32>
    %cst_7 = arith.constant dense<0.000000e+00> : vector<8xf32>
    %8 = vector.multi_reduction <add>, %7, %cst_7 [1] : vector<8x32xf32> to vector<8xf32>
    %9 = vector.shape_cast %8 : vector<8xf32> to vector<8x1xf32>
    %cst_8 = arith.constant 3.200000e+01 : f32
    %10 = vector.broadcast %cst_8 : f32 to vector<8x1xf32>
    %11 = arith.divf %9, %10 : vector<8x1xf32>
    %12 = vector.broadcast %11 : vector<8x1xf32> to vector<8x32xf32>
    %13 = arith.subf %7, %12 : vector<8x32xf32>
    %14 = vector.broadcast %11 : vector<8x1xf32> to vector<8x32xf32>
    %15 = arith.subf %7, %14 : vector<8x32xf32>
    %16 = arith.mulf %13, %15 : vector<8x32xf32>
    %cst_9 = arith.constant dense<0.000000e+00> : vector<8xf32>
    %17 = vector.multi_reduction <add>, %16, %cst_9 [1] : vector<8x32xf32> to vector<8xf32>
    %18 = vector.shape_cast %17 : vector<8xf32> to vector<8x1xf32>
    %cst_10 = arith.constant 3.200000e+01 : f32
    %19 = vector.broadcast %cst_10 : f32 to vector<8x1xf32>
    %20 = arith.divf %18, %19 : vector<8x1xf32>
    %21 = vector.broadcast %11 : vector<8x1xf32> to vector<8x32xf32>
    %22 = arith.subf %7, %21 : vector<8x32xf32>
    %cst_11 = arith.constant 9.99999974E-6 : f32
    %23 = vector.broadcast %cst_11 : f32 to vector<8x1xf32>
    %24 = arith.addf %20, %23 : vector<8x1xf32>
    %25 = math.rsqrt %24 : vector<8x1xf32>
    %26 = vector.broadcast %25 : vector<8x1xf32> to vector<8x32xf32>
    %27 = arith.mulf %22, %26 : vector<8x32xf32>
    %c0_12 = arith.constant 0 : index
    %c0_13 = arith.constant 0 : index
    %28 = vector.load %arg4[%c0_12, %c0_13] : memref<1x32xf32, #tpu.memory_space<vmem>>, vector<1x32xf32>
    %29 = vector.broadcast %28 : vector<1x32xf32> to vector<8x32xf32>
    %30 = arith.mulf %27, %29 : vector<8x32xf32>
    %c0_14 = arith.constant 0 : index
    %c0_15 = arith.constant 0 : index
    %31 = vector.load %arg5[%c0_14, %c0_15] : memref<1x32xf32, #tpu.memory_space<vmem>>, vector<1x32xf32>
    %32 = vector.broadcast %31 : vector<1x32xf32> to vector<8x32xf32>
    %33 = arith.addf %30, %32 : vector<8x32xf32>
    %cst_16 = arith.constant 0.000000e+00 : f32
    %34 = vector.broadcast %cst_16 : f32 to vector<8x32xf32>
    %35 = arith.maximumf %33, %34 : vector<8x32xf32>
    %36 = arith.truncf %35 : vector<8x32xf32> to vector<8x32xbf16>
    %c0_17 = arith.constant 0 : index
    %c0_18 = arith.constant 0 : index
    %37 = vector.load %arg6[%c0_17, %c0_18] : memref<32x32xbf16, #tpu.memory_space<vmem>>, vector<32x32xbf16>
    %cst_19 = arith.constant dense<0.000000e+00> : vector<8x32xf32>
    %38 = tpu.matmul %36, %37, %cst_19 {dimension_numbers = #tpu.dot_dimension_numbers<[1], [0], [0], [1], [0, 0, 1, 1], [], []>} : vector<8x32xbf16>, vector<32x32xbf16>, vector<8x32xf32> -> vector<8x32xf32>
    %c0_20 = arith.constant 0 : index
    %c0_21 = arith.constant 0 : index
    %39 = vector.load %arg7[%c0_20, %c0_21] : memref<1x32xf32, #tpu.memory_space<vmem>>, vector<1x32xf32>
    %40 = vector.broadcast %39 : vector<1x32xf32> to vector<8x32xf32>
    %41 = arith.addf %38, %40 : vector<8x32xf32>
    %cst_22 = arith.constant 0.000000e+00 : f32
    %42 = vector.broadcast %cst_22 : f32 to vector<8x32xf32>
    %43 = arith.maximumf %41, %42 : vector<8x32xf32>
    %44 = arith.truncf %43 : vector<8x32xf32> to vector<8x32xbf16>
    %c0_23 = arith.constant 0 : index
    %c0_24 = arith.constant 0 : index
    %45 = vector.load %arg8[%c0_23, %c0_24] : memref<32x128xbf16, #tpu.memory_space<vmem>>, vector<32x128xbf16>
    %cst_25 = arith.constant dense<0.000000e+00> : vector<8x128xf32>
    %46 = tpu.matmul %44, %45, %cst_25 {dimension_numbers = #tpu.dot_dimension_numbers<[1], [0], [0], [1], [0, 0, 1, 1], [], []>} : vector<8x32xbf16>, vector<32x128xbf16>, vector<8x128xf32> -> vector<8x128xf32>
    %c0_26 = arith.constant 0 : index
    %c0_27 = arith.constant 0 : index
    %47 = vector.load %arg9[%c0_26, %c0_27] : memref<1x128xf32, #tpu.memory_space<vmem>>, vector<1x128xf32>
    %48 = vector.broadcast %47 : vector<1x128xf32> to vector<8x128xf32>
    %49 = arith.addf %46, %48 : vector<8x128xf32>
    %c0_28 = arith.constant 0 : index
    %c0_29 = arith.constant 0 : index
    %50 = vector.load %arg10[%c0_28, %c0_29] : memref<8x128xf32, #tpu.memory_space<vmem>>, vector<8x128xf32>
    tpu.vector_store %arg10[%c0_28, %c0_29], %49 {strides = array<i32>} : memref<8x128xf32, #tpu.memory_space<vmem>>, vector<8x128xf32>,
    return
  }
  func.func @transform_0(%arg0: i32) -> (i32, i32, i32) {
    %c0_i32 = arith.constant 0 : i32
    %c0_i32_0 = arith.constant 0 : i32
    %c0_i32_1 = arith.constant 0 : i32
    return %arg0, %c0_i32, %c0_i32_0 : i32, i32, i32
  }
  func.func @transform_1(%arg0: i32) -> (i32, i32) {
    %c0_i32 = arith.constant 0 : i32
    %c0_i32_0 = arith.constant 0 : i32
    %c0_i32_1 = arith.constant 0 : i32
    return %c0_i32, %c0_i32_0 : i32, i32
  }
  func.func @transform_2(%arg0: i32) -> (i32, i32) {
    %c0_i32 = arith.constant 0 : i32
    %c0_i32_0 = arith.constant 0 : i32
    %c0_i32_1 = arith.constant 0 : i32
    return %c0_i32, %c0_i32_0 : i32, i32
  }
  func.func @transform_3(%arg0: i32) -> (i32, i32) {
    %c0_i32 = arith.constant 0 : i32
    %c0_i32_0 = arith.constant 0 : i32
    %c0_i32_1 = arith.constant 0 : i32
    return %c0_i32, %c0_i32_0 : i32, i32
  }
  func.func @transform_4(%arg0: i32) -> (i32, i32) {
    %c0_i32 = arith.constant 0 : i32
    %c0_i32_0 = arith.constant 0 : i32
    %c0_i32_1 = arith.constant 0 : i32
    return %c0_i32, %c0_i32_0 : i32, i32
  }
  func.func @transform_5(%arg0: i32) -> (i32, i32) {
    %c0_i32 = arith.constant 0 : i32
    %c0_i32_0 = arith.constant 0 : i32
    %c0_i32_1 = arith.constant 0 : i32
    return %c0_i32, %c0_i32_0 : i32, i32
  }
  func.func @transform_6(%arg0: i32) -> (i32, i32) {
    %c0_i32 = arith.constant 0 : i32
    %c0_i32_0 = arith.constant 0 : i32
    %c0_i32_1 = arith.constant 0 : i32
    return %c0_i32, %c0_i32_0 : i32, i32
  }
  func.func @transform_7(%arg0: i32) -> (i32, i32) {
    %c0_i32 = arith.constant 0 : i32
    %c0_i32_0 = arith.constant 0 : i32
    %c0_i32_1 = arith.constant 0 : i32
    return %c0_i32, %c0_i32_0 : i32, i32
  }
  func.func @transform_8(%arg0: i32) -> (i32, i32) {
    %c0_i32 = arith.constant 0 : i32
    %c0_i32_0 = arith.constant 0 : i32
    %c0_i32_1 = arith.constant 0 : i32
    return %c0_i32, %c0_i32_0 : i32, i32
  }
  func.func @transform_9(%arg0: i32) -> (i32, i32) {
    %c0_i32 = arith.constant 0 : i32
    %c0_i32_0 = arith.constant 0 : i32
    return %arg0, %c0_i32 : i32, i32
  }
}

</mosaic_0001>

<bundles_post_ra>
// kernel: _lambda_.1
= control target key start
LH: loop header
LB: loop body
LE: loop exit
PB: predicated region body
PF: predicated region fallthrough
CT: control target
= control target key end

     0   :  { %s859_s30 = smov 0   ;;  %s942_s0 = inlined_call_operand.vmem [shape: f32[24,8,32], index: 0, kind: input, shape index: {}]   ;;  %s943_s1 = inlined_call_operand.vmem [shape: bf16[32,32], index: 1, kind: input, shape index: {}]   ;;  %s944_s2 = inlined_call_operand.vmem [shape: f32[1,32], index: 2, kind: input, shape index: {}]   ;;  %s945_s3 = inlined_call_operand.vmem [shape: f32[1,32], index: 3, kind: input, shape index: {}]   ;;  %s946_s4 = inlined_call_operand.vmem [shape: f32[1,32], index: 4, kind: input, shape index: {}]   ;;  %s947_s5 = inlined_call_operand.vmem [shape: bf16[32,32], index: 5, kind: input, shape index: {}]   ;;  %s948_s6 = inlined_call_operand.vmem [shape: f32[1,32], index: 6, kind: input, shape index: {}]   ;;  %s949_s7 = inlined_call_operand.vmem [shape: bf16[32,128], index: 7, kind: input, shape index: {}]   ;;  %s950_s8 = inlined_call_operand.vmem [shape: f32[1,128], index: 8, kind: input, shape index: {}]   ;;  %s951_s9 = inlined_call_operand.vmem [shape: f32[24,128], index: 9, kind: output, shape index: {}]  }
   0x1 LB: > { %s865_s10 = sadd.s32 4294967295, %s805_s30   ;;  %p728_p0 = scmp.ge.s32.totalorder %s805_s30, 1  ;;  %s805_s30 = sphi %s859_s30, %s19_s30  }
   0x2   : > { %p288_p1 = scmp.lt.s32.totalorder %s805_s30, 4 }
   0x4   : > { %p289_p2 = pnand %p728_p0, %p288_p1 }
   0x5   : > { %s729_s15 = sshll.u32 (!%p289_p2), %s865_s10, 3  ;;  %p329_p4 = scmp.lt.s32.totalorder (!%p289_p2), %s865_s10, 2 }
   0x6   : > { %292 = sbr.rel (%p289_p2) target bundleno = 946 (0x3b2), region = 56  ;;  %p324_p3 = scmp.lt.s32.totalorder (!%p289_p2), %s729_s15, 23 }
   0xb   : > { %v791_v0 = vld [vmem:[%s943_s1 + $0x8] sm:$0xff]   ;;  %v807_v1 = vmov 0.0   ;;  %v792_v2 = vld [vmem:[%s943_s1] sm:$0xff]   ;;  %vm808_vm0 = vmmov 0   ;;  %s953_s15 = smov (!%p324_p3, %s729_s15), 23  ;;  %vm342_vm1 = vcmask 261120  }
   0xc   : > { %757 = vmatprep.subr.bf16.mxu0 %v807_v1  ;;  %765 = vmatprep.subr.bf16.mxu1 %v807_v1  ;;  %s730_s16 = sshll.u32 %s953_s15, 3  ;;  %vm434_vm2 = vcmask 1041409   ;;  %vm436_vm3 = vcmask 1042434   ;;  %vm438_vm4 = vcmask 1043459   ;;  %vm440_vm5 = vcmask 1044484   ;;  %s955_s10 = smov (!%p329_p4, %s865_s10), 2 }
   0xd   : > { %758 = vmatpush3.bf16.msra.mxu0 %v791_v0  ;;  %761 = vmatprep.mubr.msk.bf16.mxu0 %vm808_vm0, %v807_v1  ;;  %s327_s19 = scalar_lea.vmem %s942_s0, %s730_s16  ;;  %vm442_vm6 = vcmask 1045509   ;;  %vm444_vm7 = vcmask 1046534   ;;  %vm446_vm8 = vcmask 1047559   ;;  %s731_s17 = sshll.u32 %s955_s10, 3 }
   0xe   : > { %759 = vmatprep.subr.bf16.mxu0 %v807_v1  ;;  %769 = vmatprep.mubr.msk.bf16.mxu1 %vm808_vm0, %v807_v1  ;;  %v334_v3 = vld [vmem:[%s327_s19] sm:$0xff]  ;;  %v335_v4 = vld [vmem:[%s327_s19 + $0x8] sm:$0xff]  ;;  %v336_v5 = vld [vmem:[%s327_s19 + $0x10] sm:$0xff]  ;;  %s332_s22 = scalar_lea.vmem %s951_s9, %s731_s17 }
   0xf   : > { %v337_v6 = vld [vmem:[%s327_s19 + $0x18] sm:$0xff]  ;;  %v338_v7 = vld [vmem:[%s327_s19 + $0x20] sm:$0xff]  ;;  %v339_v8 = vld [vmem:[%s327_s19 + $0x28] sm:$0xff]  ;;  %v343_v9 = vsel %vm342_vm1, %v334_v3, 0.0  ;;  %v350_v10 = vsel %vm342_vm1, %v335_v4, 0.0  ;;  %v357_v11 = vsel %vm342_vm1, %v336_v5, 0.0 }
  0x10   : > { %v340_v12 = vld [vmem:[%s327_s19 + $0x30] sm:$0xff]  ;;  %v341_v13 = vld [vmem:[%s327_s19 + $0x38] sm:$0xff]  ;;  %v344_v14 = vrot.slane %v343_v9, 4  ;;  %v351_v15 = vrot.slane %v350_v10, 4  ;;  %v358_v16 = vrot.slane %v357_v11, 4  ;;  %v364_v17 = vsel %vm342_vm1, %v337_v6, 0.0 }
  0x11   : > { %760 = vmatpush3.bf16.msra.mxu0 %v792_v2  ;;  %v365_v18 = vrot.slane %v364_v17, 4  ;;  %v371_v19 = vsel %vm342_vm1, %v338_v7, 0.0  ;;  %v378_v20 = vsel %vm342_vm1, %v339_v8, 0.0  ;;  %v385_v21 = vsel %vm342_vm1, %v340_v12, 0.0 }
  0x12   : > { %773 = vmatprep.subr.bf16.mxu0 %v807_v1  ;;  %v345_v22 = vadd.f32 %v344_v14, %v343_v9  ;;  %v352_v23 = vadd.f32 %v351_v15, %v350_v10  ;;  %v359_v24 = vadd.f32 %v358_v16, %v357_v11  ;;  %v372_v25 = vrot.slane %v371_v19, 4 }
  0x13   : > { %v366_v26 = vadd.f32 %v365_v18, %v364_v17  ;;  %v379_v27 = vrot.slane %v378_v20, 4  ;;  %v386_v28 = vrot.slane %v385_v21, 4  ;;  %v392_v29 = vsel %vm342_vm1, %v341_v13, 0.0 }
  0x14   : > { %v346_v30 = vrot.slane %v345_v22, 2  ;;  %v353_v31 = vrot.slane %v352_v23, 2  ;;  %v360_v32 = vrot.slane %v359_v24, 2  ;;  %v373_v33 = vadd.f32 %v372_v25, %v371_v19 }
  0x15   : > { %v367_v34 = vrot.slane %v366_v26, 2  ;;  %v380_v35 = vadd.f32 %v379_v27, %v378_v20  ;;  %v387_v36 = vadd.f32 %v386_v28, %v385_v21  ;;  %v393_v37 = vrot.slane %v392_v29, 4  ;;  %v732_v28 = vld [vmem:[%s944_s2] ss:$0 sm:$0xff] }
  0x16   : > { %v347_v38 = vadd.f32 %v346_v30, %v345_v22  ;;  %v354_v39 = vadd.f32 %v353_v31, %v352_v23  ;;  %v361_v40 = vadd.f32 %v360_v32, %v359_v24  ;;  %v374_v41 = vrot.slane %v373_v33, 2 }
  0x17   : > { %v368_v42 = vadd.f32 %v367_v34, %v366_v26  ;;  %v381_v43 = vrot.slane %v380_v35, 2  ;;  %v388_v44 = vrot.slane %v387_v36, 2  ;;  %v394_v45 = vadd.f32 %v393_v37, %v392_v29 }
  0x18   : > { %v348_v46 = vrot.slane %v347_v38, 1  ;;  %v355_v47 = vrot.slane %v354_v39, 1  ;;  %v362_v48 = vrot.slane %v361_v40, 1  ;;  %v375_v49 = vadd.f32 %v374_v41, %v373_v33  ;;  %v794_v41 = vld [vmem:[%s947_s5] sm:$0xff]  }
  0x19   : > { %v369_v50 = vrot.slane %v368_v42, 1  ;;  %v382_v51 = vadd.f32 %v381_v43, %v380_v35  ;;  %v389_v52 = vadd.f32 %v388_v44, %v387_v36  ;;  %v395_v53 = vrot.slane %v394_v45, 2 }
  0x1a   : > { %v349_v54 = vadd.f32 %v348_v46, %v347_v38  ;;  %v356_v55 = vadd.f32 %v355_v47, %v354_v39  ;;  %v363_v56 = vadd.f32 %v362_v48, %v361_v40  ;;  %v376_v57 = vrot.slane %v375_v49, 1  ;;  %v793_v40 = vld [vmem:[%s947_s5 + $0x8] sm:$0xff]   ;;  %v736_v47 = vld [vmem:[%s945_s3] ss:$0 sm:$0xff] }
  0x1b   : > { %v370_v58 = vadd.f32 %v369_v50, %v368_v42  ;;  %v383_v59 = vrot.slane %v382_v51, 1  ;;  %v390_v60 = vrot.slane %v389_v52, 1  ;;  %v396_v61 = vadd.f32 %v395_v53, %v394_v45  ;;  %766 = vmatpush3.bf16.msra.mxu1 %v793_v40  ;;  %v795_v42 = vld [vmem:[%s949_s7 + $0x8] sm:$0xff]   ;;  %v796_v53 = vld [vmem:[%s949_s7] sm:$0xff]  }
  0x1c   : > { %v377_v62 = vadd.f32 %v376_v57, %v375_v49  ;;  %v399_v63 = vpack.c.bf16 %v349_v54, %v349_v54  ;;  %v400_v0 = vpack.c.bf16 %v356_v55, %v356_v55  ;;  %v401_v2 = vpack.c.bf16 %v363_v56, %v363_v56  ;;  %767 = vmatprep.subr.bf16.mxu1 %v807_v1  ;;  %v737_v49 = vld [vmem:[%s946_s4] ss:$0 sm:$0xff] }
  0x1d   : > { %v384_v3 = vadd.f32 %v383_v59, %v382_v51  ;;  %v391_v4 = vadd.f32 %v390_v60, %v389_v52  ;;  %v397_v5 = vrot.slane %v396_v61, 1  ;;  %v402_v6 = vpack.c.bf16 %v370_v58, %v370_v58  ;;  %v738_v54 = vld [vmem:[%s948_s6] ss:$0 sm:$0xff] }
  0x1e   : > { %v403_v7 = vpack.c.bf16 %v377_v62, %v377_v62  ;;  %v426_v8 = vunpack.c.l.b16 %v399_v63  ;;  %v427_v9 = vunpack.c.l.b16 %v400_v0  ;;  %v428_v10 = vunpack.c.l.b16 %v401_v2  ;;  %v742_v62 = vld [vmem:[%s950_s8] ss:$0 sm:$0xff] }
  0x1f   : > { %v398_v11 = vadd.f32 %v397_v5, %v396_v61  ;;  %v404_v12 = vpack.c.bf16 %v384_v3, %v384_v3  ;;  %v405_v13 = vpack.c.bf16 %v391_v4, %v391_v4  ;;  %v429_v14 = vunpack.c.l.b16 %v402_v6  ;;  %768 = vmatpush3.bf16.msra.mxu1 %v794_v41 }
  0x20   : > { %v430_v15 = vunpack.c.l.b16 %v403_v7  ;;  %v435_v16 = vsel %vm434_vm2, %v427_v9, %v426_v8 }
  0x21   : > { %v406_v17 = vpack.c.bf16 %v398_v11, %v398_v11  ;;  %v431_v18 = vunpack.c.l.b16 %v404_v12  ;;  %v432_v19 = vunpack.c.l.b16 %v405_v13  ;;  %v437_v20 = vsel %vm436_vm3, %v428_v10, %v435_v16 }
  0x22   : > { %v439_v21 = vsel %vm438_vm4, %v429_v14, %v437_v20 }
  0x23   : > { %v433_v22 = vunpack.c.l.b16 %v406_v17  ;;  %v441_v23 = vsel %vm440_vm5, %v430_v15, %v439_v21 }
  0x24   : > { %v443_v24 = vsel %vm442_vm6, %v431_v18, %v441_v23 }
  0x25   : > { %v445_v25 = vsel %vm444_vm7, %v432_v19, %v443_v24 }
  0x26   : > { %v447_v26 = vsel %vm446_vm8, %v433_v22, %v445_v25 }
  0x27   : > { %v448_v27 = vpack.c.b16 %v447_v26, %v447_v26 }
  0x29   : > { %762 = vmatmul.mubr.msk.bf16.vlgmr.msra.gmra.mxu0 %vm342_vm1, %v448_v27 }
  0x2a   : > { %777 = vmatprep.mubr.msk.bf16.mxu0 %vm808_vm0, %v807_v1  ;;  %774 = vmatpush3.bf16.msra.mxu0 %v795_v42 }
  0x2b   : > { %775 = vmatprep.subr.bf16.mxu0 %v807_v1 }
  0x2e   : > { %776 = vmatpush3.bf16.msra.mxu0 %v796_v53 }
  0xe9   : > { %v498_v29 = vpop.f32.mrf.mxu0 }
  0xea   : > { %v499_v30 = vadd.f32 %v732_v28, %v498_v29 }
  0xeb   : > { %v763_v31 = vpop.f32.mrf.mxu0 }
  0xec   : > { %v504_v32 = vsel %vm342_vm1, %v499_v30, 0.0 }
  0xed   : > { %505 = vadd.xlane.f32.xlu0 %v504_v32  ;;  %v501_v33 = vpop.f32.mrf.mxu0 }
  0xef   : > { %v764_v34 = vpop.f32.mrf.mxu0 }
 0x176   : > { %v506_v35 = vpop.xlane.xlu0 %505 }
 0x177   : > { %v508_v36 = vmul.f32 0.03125, %v506_v35 }
 0x179   : > { %v509_v37 = vsub.f32 %v499_v30, %v508_v36 }
 0x17b   : > { %v510_v38 = vmul.f32 %v509_v37, %v509_v37 }
 0x17d   : > { %v511_v39 = vsel %vm342_vm1, %v510_v38, 0.0 }
 0x17e   : > { %512 = vadd.xlane.f32.xlu0 %v511_v39 }
 0x207   : > { %v513_v43 = vpop.xlane.xlu0 %512 }
 0x208   : > { %v514_v44 = vmul.f32 0.03125, %v513_v43 }
 0x20a   : > { %v515_v45 = vadd.f32 1e-05, %v514_v44 }
 0x20c   : > { %797 = vrsqrt.f32 %v515_v45 }
 0x219   : > { %v798_v46 = vpop.eup %797 }
 0x21a   : > { %v517_v48 = vmul.f32 %v798_v46, %v509_v37 }
 0x21c   : > { %v525_v50 = vmul.f32 %v736_v47, %v517_v48 }
 0x21e   : > { %v533_v51 = vadd.f32 %v737_v49, %v525_v50 }
 0x220   : > { %v534_v52 = vmax.f32 %v533_v51, 0.0 }
 0x222   : > { %v535_v1 = vpack.c.bf16 %v534_v52, %v534_v52 }
 0x224   : > { %770 = vmatmul.mubr.msk.bf16.vlgmr.msra.gmra.mxu1 %vm342_vm1, %v535_v1 }
 0x2e4   : > { %v596_v55 = vpop.f32.mrf.mxu1 }
 0x2e5   : > { %v597_v56 = vadd.f32 %v738_v54, %v596_v55 }
 0x2e6   : > { %v771_v57 = vpop.f32.mrf.mxu1 }
 0x2e7   : > { %v602_v58 = vmax.f32 %v597_v56, 0.0 }
 0x2e8   : > { %v599_v59 = vpop.f32.mrf.mxu1 }
 0x2e9   : > { %v603_v60 = vpack.c.bf16 %v602_v58, %v602_v58 }
 0x2ea   : > { %v772_v61 = vpop.f32.mrf.mxu1 }
 0x2eb   : > { %778 = vmatmul.mubr.msk.bf16.vlgmr.msra.gmra.mxu0 %vm342_vm1, %v603_v60 }
 0x3ab   : > { %v664_v63 = vpop.f32.mrf.mxu0 }
 0x3ac   : > { %v665_v0 = vadd.f32 %v742_v62, %v664_v63 }
 0x3ad   : > { %v779_v2 = vpop.f32.mrf.mxu0 }
 0x3ae   : > { %670 = vst [vmem:[%s332_s22] sm:$0xff] %v665_v0 }
 0x3af   : > { %v667_v3 = vpop.f32.mrf.mxu0 }
 0x3b1   : > { %v780_v4 = vpop.f32.mrf.mxu0 }
 0x3b2 PF: > { %s19_s30 = sadd.s32 1, %s805_s30  }
 0x3b3   : > { %p16_p5 = scmp.ge.s32.totalorder %s19_s30, 5  }
 0x3b5   :  { %18 = sbr.rel (!%p16_p5) target bundleno = 1 (0x1), region = 86 }

</bundles_post_ra>
